<compile_context>
chip_gen: v6e
topology: v6e:2x2x1
jax: 0.10.0
libtpu: 0.0.40
codegen_flags: <defaults>
</compile_context>

<pallas_src>
import functools

import jax
import jax.numpy as jnp
from jax import lax
from jax.experimental import pallas as pl
from jax.experimental.pallas import tpu as pltpu


def _round_up(x, m):
    return ((x + m - 1) // m) * m


def _dot(a, b, transpose_b):
    if transpose_b:
        # Contract last axis of a with last axis of b (b is [N, K]).
        return lax.dot_general(
            a, b, (((1,), (1,)), ((), ())), preferred_element_type=jnp.float32
        )
    return jnp.dot(a, b, preferred_element_type=jnp.float32)


# ----------------------------------------------------------------------------
# Single-block kernel: whole operands in VMEM, no grid, no accumulator scratch.
# ----------------------------------------------------------------------------
def _single_block_kernel(a_ref, b_ref, o_ref, *, transpose_b):
    o_ref[...] = _dot(a_ref[...], b_ref[...], transpose_b).astype(o_ref.dtype)


# ----------------------------------------------------------------------------
# Tiled kernel: (i, j) parallel output tiles, K ("arbitrary", last) reduction
# with an f32 accumulator resident in VMEM scratch.
# ----------------------------------------------------------------------------
def _matmul_kernel(a_ref, b_ref, o_ref, acc_ref, *, transpose_b):
    @pl.when(pl.program_id(2) == 0)
    def _():
        acc_ref[...] = jnp.zeros_like(acc_ref)

    acc_ref[...] += _dot(a_ref[...], b_ref[...], transpose_b)

    @pl.when(pl.program_id(2) == pl.num_programs(2) - 1)
    def _():
        o_ref[...] = acc_ref[...].astype(o_ref.dtype)


# Problems whose (A + B + O) footprint is below this run as one VMEM block.
_SINGLE_BLOCK_BYTES = 2 * 1024 * 1024


def backward_linear_matmul(grad_output, weight, weight_transposed=False):
    """grad_output @ weight (or @ weight.T) on the MXU via Pallas."""
    a = grad_output
    b = weight
    M, K = a.shape
    if weight_transposed:
        N, Kb = b.shape  # weight is [in_features, out_features]
    else:
        Kb, N = b.shape  # weight is [out_features, in_features]
    assert K == Kb, "contraction dims must match"

    out_dtype = a.dtype
    itemsize = jnp.dtype(out_dtype).itemsize
    total_bytes = (a.size + b.size + M * N) * itemsize

    # --- tiny path: single MXU burst, no grid, no padding needed -------------
    if total_bytes <= _SINGLE_BLOCK_BYTES:
        kernel = functools.partial(
            _single_block_kernel, transpose_b=weight_transposed
        )
        return pl.pallas_call(
            kernel,
            out_shape=jax.ShapeDtypeStruct((M, N), out_dtype),
        )(a, b)

    # --- tiled path -----------------------------------------------------------
    tm = min(_round_up(M, 8), 256)     # clamp to batch; 256 fills MXU rows
    tn = min(_round_up(N, 128), 512)   # lane-dense, 256-multiple when large
    tk = min(_round_up(K, 128), 512)

    Mp, Np, Kp = _round_up(M, tm), _round_up(N, tn), _round_up(K, tk)

    if (Mp, Kp) != (M, K):
        a = jnp.pad(a, ((0, Mp - M), (0, Kp - K)))

    if weight_transposed:
        if (Np, Kp) != (N, K):
            b = jnp.pad(b, ((0, Np - N), (0, Kp - K)))
        b_spec = pl.BlockSpec((tn, tk), lambda i, j, k: (j, k))
    else:
        if (Kp, Np) != (K, N):
            b = jnp.pad(b, ((0, Kp - K), (0, Np - N)))
        b_spec = pl.BlockSpec((tk, tn), lambda i, j, k: (k, j))

    kernel = functools.partial(_matmul_kernel, transpose_b=weight_transposed)

    out = pl.pallas_call(
        kernel,
        out_shape=jax.ShapeDtypeStruct((Mp, Np), out_dtype),
        grid_spec=pltpu.PrefetchScalarGridSpec(
            num_scalar_prefetch=0,
            grid=(Mp // tm, Np // tn, Kp // tk),
            in_specs=[
                pl.BlockSpec((tm, tk), lambda i, j, k: (i, k)),
                b_spec,
            ],
            out_specs=pl.BlockSpec((tm, tn), lambda i, j, k: (i, j)),
            scratch_shapes=[pltpu.VMEM((tm, tn), jnp.float32)],
        ),
        compiler_params=pltpu.CompilerParams(
            dimension_semantics=("parallel", "parallel", "arbitrary"),
            vmem_limit_bytes=32 * 1024 * 1024,
        ),
    )(a, b)

    if (Mp, Np) != (M, N):
        out = out[:M, :N]
    return out


class BackwardModuleLinear:
    """JAX/Pallas equivalent of the PyTorch BackwardModuleLinear module."""

    def __init__(self, weight, weight_transposed=False):
        self.weight = weight
        self.weight_transposed = weight_transposed

    def __call__(self, grad_output):
        return backward_linear_matmul(
            grad_output, self.weight, self.weight_transposed
        )


def _check(name, grad_output, weight, weight_transposed):
    mod = BackwardModuleLinear(weight, weight_transposed=weight_transposed)
    got = jax.block_until_ready(mod(grad_output))
    w_eff = weight.T if weight_transposed else weight
    ref = jnp.dot(grad_output, w_eff, precision=lax.Precision.HIGHEST)
    K = grad_output.shape[1]
    # Tolerance sized for the MXU's reduced-precision f32 path over K terms.
    atol = 0.02 * (K ** 0.5)
    assert got.shape == ref.shape, (name, got.shape, ref.shape)
    assert jnp.allclose(got, ref, rtol=2e-2, atol=atol), name
    return got


if __name__ == "__main__":
    key = jax.random.PRNGKey(0)
    k1, k2, k3, k4, k5, k6 = jax.random.split(key, 6)

    # 1) Small shape -> single-block (no grid) path.
    B, OUT_F, IN_F = 16, 256, 128
    go = jax.random.normal(k1, (B, OUT_F), dtype=jnp.float32)
    w = jax.random.normal(k2, (OUT_F, IN_F), dtype=jnp.float32)
    _check("small", go, w, weight_transposed=False)
    _check("small_T", go, jnp.asarray(w.T), weight_transposed=True)

    # 2) Larger, tile-aligned shape -> tiled accumulator path.
    B2, OUT2, IN2 = 64, 1024, 1024
    go2 = jax.random.normal(k3, (B2, OUT2), dtype=jnp.float32)
    w2 = jax.random.normal(k4, (OUT2, IN2), dtype=jnp.float32)
    _check("tiled", go2, w2, weight_transposed=False)
    _check("tiled_T", go2, jnp.asarray(w2.T), weight_transposed=True)

    # 3) Non-multiple shape -> tiled path with zero padding + slice.
    B3, OUT3, IN3 = 100, 700, 900
    go3 = jax.random.normal(k5, (B3, OUT3), dtype=jnp.float32)
    w3 = jax.random.normal(k6, (OUT3, IN3), dtype=jnp.float32)
    _check("padded", go3, w3, weight_transposed=False)
    _check("padded_T", go3, jnp.asarray(w3.T), weight_transposed=True)

    print("KERNEL_OK")
</pallas_src>

<mosaic_0001>
module attributes {stable_mosaic.version = 11 : i64} {
  func.func @_single_block_kernel(%arg0: memref<16x256xf32, #tpu.memory_space<vmem>>, %arg1: memref<256x128xf32, #tpu.memory_space<vmem>>, %arg2: memref<16x128xf32, #tpu.memory_space<vmem>>) attributes {dimension_semantics = [], scalar_prefetch = 0 : i64, scratch_operands = 0 : i64, tpu.core_type = #tpu.core_type<tc>} {
    %c0 = arith.constant 0 : index
    %c0_0 = arith.constant 0 : index
    %0 = vector.load %arg0[%c0, %c0_0] : memref<16x256xf32, #tpu.memory_space<vmem>>, vector<16x256xf32>
    %c0_1 = arith.constant 0 : index
    %c0_2 = arith.constant 0 : index
    %1 = vector.load %arg1[%c0_1, %c0_2] : memref<256x128xf32, #tpu.memory_space<vmem>>, vector<256x128xf32>
    %cst = arith.constant dense<0.000000e+00> : vector<16x128xf32>
    %2 = tpu.matmul %0, %1, %cst {dimension_numbers = #tpu.dot_dimension_numbers<[1], [0], [0], [1], [0, 0, 1, 1], [], []>} : vector<16x256xf32>, vector<256x128xf32>, vector<16x128xf32> -> vector<16x128xf32>
    %c0_3 = arith.constant 0 : index
    %c0_4 = arith.constant 0 : index
    %3 = vector.load %arg2[%c0_3, %c0_4] : memref<16x128xf32, #tpu.memory_space<vmem>>, vector<16x128xf32>
    tpu.vector_store %arg2[%c0_3, %c0_4], %2 {strides = array<i32>} : memref<16x128xf32, #tpu.memory_space<vmem>>, vector<16x128xf32>,
    return
  }
}

</mosaic_0001>

<bundles_post_ra>
// kernel: tpu_custom_call.1
= control target key start
LH: loop header
LB: loop body
LE: loop exit
PB: predicated region body
PF: predicated region fallthrough
CT: control target
= control target key end

     0   :  { %7 = vsyncpa [#allocation3], 0  ;;  %s351_s0 = inlined_call_operand.hbm [shape: f32[16,256], index: 0, kind: input, shape index: {}]   ;;  %s352_s1 = inlined_call_operand.hbm [shape: f32[256,128], index: 1, kind: input, shape index: {}]   ;;  %s353_s2 = inlined_call_operand.hbm [shape: f32[16,128], index: 2, kind: output, shape index: {}]  }
   0x1   :  { %8 = vsyncpa [#allocation6], 0 }
   0x2   :  { %9 = vsyncpa [#allocation4], 0  ;;  %s314_s9 = smov [#allocation2]  }
   0x3   :  { %s15_s10 = sshll.u32 %s314_s9, 4  ;;  %s16_s10 = int_to_ptr.vmem [resolvable:$true] %s15_s10 }
   0x4   :  { %s256_s11 = scalar_lea.vmem %s16_s10, 512  ;;  %p261_p1 = scmp.lt.s32.totalorder %s16_s10, %s16_s10 }
   0x5   :  { %p257_p0 = scmp.ne.s32.totalorder %s16_s10, %s256_s11  ;;  %p262_p2 = scmp.lt.s32.totalorder %s256_s11, %s256_s11 }
   0x7   :  { %p263_p3 = por %p262_p2, %p261_p1 }
   0x9   :  { %p264_p4 = pnand %p263_p3, %p257_p0 }
   0xb   :  { %267 = shalt.err (!%p264_p4)
}
   0xc   :  { %s315_s12 = smov 256   ;;  %s316_s13 = smov 16  }
   0xd   :  { %21 = dma.hbm_to_vmem [thread:$0]  %s351_s0, 512, %s16_s10, [#allocation3], %s315_s12, %s315_s12, %s316_s13  }
   0xe   :  { %s317_s16 = smov [#allocation5]  }
   0xf   :  { %s27_s17 = sshll.u32 %s317_s16, 4  ;;  %s28_s17 = int_to_ptr.vmem [resolvable:$true] %s27_s17 }
  0x10   :  { %s276_s18 = scalar_lea.vmem %s28_s17, 4096  ;;  %p281_p6 = scmp.lt.s32.totalorder %s28_s17, %s28_s17 }
  0x11   :  { %p277_p5 = scmp.ne.s32.totalorder %s28_s17, %s276_s18  ;;  %p282_p7 = scmp.lt.s32.totalorder %s276_s18, %s276_s18 }
  0x13   :  { %p283_p8 = por %p282_p7, %p281_p6 }
  0x15   :  { %p284_p9 = pnand %p283_p8, %p277_p5 }
  0x17   :  { %287 = shalt.err (!%p284_p9)
}
  0x18   :  { %s318_s19 = smov 128   ;;  %s319_s20 = smov 8  }
  0x19   :  { %33 = dma.hbm_to_vmem [thread:$0]  %s352_s1, 4096, %s28_s17, [#allocation6], %s318_s19, %s318_s19, %s319_s20  }
  0x1a   :  { %308 = dma.done.wait [#allocation3], 512  }
  0x1b   :  { %309 = vsyncadd [#allocation3], 4294966784 }
  0x1c   :  { %310 = dma.done.wait [#allocation6], 4096  }
  0x1d   :  { %311 = vsyncadd [#allocation6], 4294963200  ;;  %v75_v0 = vld [vmem:[#allocation5 + $0xf8] sm:$0xff]  ;;  %v74_v2 = vld [vmem:[#allocation5 + $0xf0] sm:$0xff]  ;;  %s320_s0 = smov [#allocation7]  }
  0x1e   :  { %v59_v1 = vld [vmem:[#allocation5 + $0x78] sm:$0xff]  ;;  %171 = vmatprep.subr.mxu0 %v75_v0  ;;  %209 = vmatprep.subr.mxu1 %v75_v0  ;;  %v58_v3 = vld [vmem:[#allocation5 + $0x70] sm:$0xff]  ;;  %v73_v4 = vld [vmem:[#allocation5 + $0xe8] sm:$0xff]  ;;  %s158_s1 = sshll.u32 %s320_s0, 4  ;;  %s159_s1 = int_to_ptr.vmem [resolvable:$true] %s158_s1 }
  0x1f   :  { %172 = vmatpush3.msra.mxu0 %v59_v1  ;;  %225 = vmatpush3.msra.mxu1 %v59_v1  ;;  %v57_v5 = vld [vmem:[#allocation5 + $0x68] sm:$0xff]  ;;  %v72_v6 = vld [vmem:[#allocation5 + $0xe0] sm:$0xff]  ;;  %v71_v8 = vld [vmem:[#allocation5 + $0xd8] sm:$0xff]  ;;  %s288_s23 = scalar_lea.vmem %s159_s1, 256  ;;  %p293_p11 = scmp.lt.s32.totalorder %s159_s1, %s159_s1 }
  0x20   :  { %173 = vmatprep.subr.mxu0 %v74_v2  ;;  %210 = vmatprep.subr.mxu1 %v74_v2  ;;  %v56_v7 = vld [vmem:[#allocation5 + $0x60] sm:$0xff]  ;;  %v55_v9 = vld [vmem:[#allocation5 + $0x58] sm:$0xff]  ;;  %v70_v10 = vld [vmem:[#allocation5 + $0xd0] sm:$0xff]  ;;  %p289_p10 = scmp.ne.s32.totalorder %s159_s1, %s288_s23  ;;  %p294_p12 = scmp.lt.s32.totalorder %s288_s23, %s288_s23 }
  0x21   :  { %174 = vmatpush3.msra.mxu0 %v58_v3  ;;  %226 = vmatpush3.msra.mxu1 %v58_v3  ;;  %v54_v11 = vld [vmem:[#allocation5 + $0x50] sm:$0xff]  ;;  %v69_v12 = vld [vmem:[#allocation5 + $0xc8] sm:$0xff]  ;;  %v68_v14 = vld [vmem:[#allocation5 + $0xc0] sm:$0xff] }
  0x22   :  { %175 = vmatprep.subr.mxu0 %v73_v4  ;;  %211 = vmatprep.subr.mxu1 %v73_v4  ;;  %v53_v13 = vld [vmem:[#allocation5 + $0x48] sm:$0xff]  ;;  %v52_v15 = vld [vmem:[#allocation5 + $0x40] sm:$0xff]  ;;  %v67_v16 = vld [vmem:[#allocation5 + $0xb8] sm:$0xff]  ;;  %p295_p13 = por %p294_p12, %p293_p11 }
  0x23   :  { %176 = vmatpush3.msra.mxu0 %v57_v5  ;;  %227 = vmatpush3.msra.mxu1 %v57_v5  ;;  %v51_v17 = vld [vmem:[#allocation5 + $0x38] sm:$0xff]  ;;  %v66_v18 = vld [vmem:[#allocation5 + $0xb0] sm:$0xff]  ;;  %v65_v20 = vld [vmem:[#allocation5 + $0xa8] sm:$0xff] }
  0x24   :  { %177 = vmatprep.subr.mxu0 %v72_v6  ;;  %212 = vmatprep.subr.mxu1 %v72_v6  ;;  %v50_v19 = vld [vmem:[#allocation5 + $0x30] sm:$0xff]  ;;  %v49_v21 = vld [vmem:[#allocation5 + $0x28] sm:$0xff]  ;;  %v64_v22 = vld [vmem:[#allocation5 + $0xa0] sm:$0xff]  ;;  %p296_p0 = pnand %p295_p13, %p289_p10 }
  0x25   :  { %178 = vmatpush3.msra.mxu0 %v56_v7  ;;  %228 = vmatpush3.msra.mxu1 %v56_v7  ;;  %v48_v23 = vld [vmem:[#allocation5 + $0x20] sm:$0xff]  ;;  %v63_v24 = vld [vmem:[#allocation5 + $0x98] sm:$0xff]  ;;  %v62_v26 = vld [vmem:[#allocation5 + $0x90] sm:$0xff] }
  0x26   :  { %179 = vmatprep.subr.mxu0 %v71_v8  ;;  %213 = vmatprep.subr.mxu1 %v71_v8  ;;  %v47_v25 = vld [vmem:[#allocation5 + $0x18] sm:$0xff]  ;;  %v46_v27 = vld [vmem:[#allocation5 + $0x10] sm:$0xff]  ;;  %v61_v28 = vld [vmem:[#allocation5 + $0x88] sm:$0xff] }
  0x27   :  { %180 = vmatpush3.msra.mxu0 %v55_v9  ;;  %229 = vmatpush3.msra.mxu1 %v55_v9  ;;  %v45_v29 = vld [vmem:[#allocation5 + $0x8] sm:$0xff]  ;;  %v60_v30 = vld [vmem:[#allocation5 + $0x80] sm:$0xff]  ;;  %v43_v33 = vld [vmem:[#allocation2 + $0x18] sm:$0xff] }
  0x28   :  { %181 = vmatprep.subr.mxu0 %v70_v10  ;;  %214 = vmatprep.subr.mxu1 %v70_v10  ;;  %v44_v31 = vld [vmem:[#allocation5] sm:$0xff]  ;;  %v41_v32 = vld [vmem:[#allocation2 + $0x8] sm:$0xff]  ;;  %v42_v35 = vld [vmem:[#allocation2 + $0x10] sm:$0xff] }
  0x29   :  { %182 = vmatpush3.msra.mxu0 %v54_v11  ;;  %230 = vmatpush3.msra.mxu1 %v54_v11  ;;  %v40_v34 = vld [vmem:[#allocation2] sm:$0xff] }
  0x2a   :  { %183 = vmatprep.subr.mxu0 %v69_v12  ;;  %215 = vmatprep.subr.mxu1 %v69_v12 }
  0x2b   :  { %184 = vmatpush3.msra.mxu0 %v53_v13  ;;  %231 = vmatpush3.msra.mxu1 %v53_v13 }
  0x2c   :  { %185 = vmatprep.subr.mxu0 %v68_v14  ;;  %216 = vmatprep.subr.mxu1 %v68_v14 }
  0x2d   :  { %186 = vmatpush3.msra.mxu0 %v52_v15  ;;  %232 = vmatpush3.msra.mxu1 %v52_v15 }
  0x2e   :  { %187 = vmatprep.subr.mxu0 %v67_v16  ;;  %217 = vmatprep.subr.mxu1 %v67_v16 }
  0x2f   :  { %188 = vmatpush3.msra.mxu0 %v51_v17  ;;  %233 = vmatpush3.msra.mxu1 %v51_v17 }
  0x30   :  { %189 = vmatprep.subr.mxu0 %v66_v18  ;;  %218 = vmatprep.subr.mxu1 %v66_v18 }
  0x31   :  { %190 = vmatpush3.msra.mxu0 %v50_v19  ;;  %234 = vmatpush3.msra.mxu1 %v50_v19 }
  0x32   :  { %191 = vmatprep.subr.mxu0 %v65_v20  ;;  %219 = vmatprep.subr.mxu1 %v65_v20 }
  0x33   :  { %192 = vmatpush3.msra.mxu0 %v49_v21  ;;  %235 = vmatpush3.msra.mxu1 %v49_v21 }
  0x34   :  { %193 = vmatprep.subr.mxu0 %v64_v22  ;;  %220 = vmatprep.subr.mxu1 %v64_v22 }
  0x35   :  { %194 = vmatpush3.msra.mxu0 %v48_v23  ;;  %236 = vmatpush3.msra.mxu1 %v48_v23 }
  0x36   :  { %195 = vmatprep.subr.mxu0 %v63_v24  ;;  %221 = vmatprep.subr.mxu1 %v63_v24 }
  0x37   :  { %196 = vmatpush3.msra.mxu0 %v47_v25  ;;  %237 = vmatpush3.msra.mxu1 %v47_v25 }
  0x38   :  { %197 = vmatprep.subr.mxu0 %v62_v26  ;;  %222 = vmatprep.subr.mxu1 %v62_v26 }
  0x39   :  { %198 = vmatpush3.msra.mxu0 %v46_v27  ;;  %238 = vmatpush3.msra.mxu1 %v46_v27 }
  0x3a   :  { %199 = vmatprep.subr.mxu0 %v61_v28  ;;  %223 = vmatprep.subr.mxu1 %v61_v28 }
  0x3b   :  { %200 = vmatpush3.msra.mxu0 %v45_v29  ;;  %239 = vmatpush3.msra.mxu1 %v45_v29 }
  0x3c   :  { %201 = vmatprep.subr.mxu0 %v60_v30  ;;  %224 = vmatprep.subr.mxu1 %v60_v30 }
  0x3d   :  { %202 = vmatpush3.msra.mxu0 %v44_v31  ;;  %240 = vmatpush3.msra.mxu1 %v44_v31 }
  0x3e   :  { %140 = vmatprep.mubr.f32.mxu0 %v41_v32  ;;  %145 = vmatprep.mubr.f32.mxu1 %v43_v33 }
  0x3f   :  { %141 = vmatmul.mubr.f32.vlgmr.msra.gmra.mxu0 %v40_v34  ;;  %146 = vmatmul.mubr.f32.vlgmr.msra.gmra.mxu1 %v42_v35 }
  0xff   :  { %v203_v36 = vpop.f32.mrf.mxu0  ;;  %v206_v37 = vpop.f32.mrf.mxu1 }
 0x101   :  { %v204_v38 = vpop.f32.mrf.mxu0  ;;  %v207_v39 = vpop.f32.mrf.mxu1 }
 0x102   :  { %v205_v40 = vadd.f32 %v204_v38, %v203_v36  ;;  %v208_v41 = vadd.f32 %v207_v39, %v206_v37 }
 0x104   :  { %151 = vst [vmem:[#allocation7] sm:$0xff] %v205_v40  ;;  %152 = vst [vmem:[#allocation7 + $0x8] sm:$0xff] %v208_v41 }
 0x105   :  { %299 = shalt.err (!%p296_p0)
}
 0x106   :  { %164 = dma.vmem_to_hbm [thread:$0]  %s159_s1, 256, %s353_s2, [#allocation4], %s318_s19, %s318_s19, %s319_s20  }
 0x107   :  { %312 = dma.done.wait [#allocation4], 256  }
 0x108   :  { %313 = vsyncadd [#allocation4], 4294967040 }
 0x109   :  { %168 = vsyncpa [#allocation3], 1 }
 0x10a   :  { %169 = vsyncpa [#allocation6], 1 }
 0x10b   :  { %170 = vsyncpa [#allocation4], 1 }

</bundles_post_ra>
